<compile_context>
chip_gen: v7x
topology: tpu7x:2x2x1
jax: 0.10.0
libtpu: 0.0.40
codegen_flags: <defaults>
</compile_context>

<pallas_src>
import jax
import jax.numpy as jnp
from jax.experimental import pallas as pl
from jax.experimental.pallas import tpu as pltpu

_LANES = 128
_BLOCK_ROWS = 2048  # multiple of 8; 2048*128*4B = 1 MiB per f32 buffer


def _ada_sigmoid_kernel(half_alpha_ref, x_ref, o_ref):
    # half_alpha_ref: SMEM scalar (shape (1,)) holding 0.5 * alpha.
    # x_ref / o_ref: (block_rows, 128) VMEM tiles in the I/O dtype.
    ha = half_alpha_ref[0]
    x = x_ref[...].astype(jnp.float32)
    # sigmoid(a*x) == 0.5 * (tanh(0.5*a*x) + 1)  -- single EUP op per element.
    y = 0.5 * (jnp.tanh(ha * x) + 1.0)
    o_ref[...] = y.astype(o_ref.dtype)


def ada_sigmoid(x, alpha, block_rows=_BLOCK_ROWS):
    """Elementwise 1/(1+exp(-alpha*x)) via a Pallas TPU kernel.

    x: any-shape float array (NCHW in the reference usage).
    alpha: python float or 0-d array (the learnable scalar parameter).
    """
    orig_shape = x.shape
    orig_dtype = x.dtype

    flat = x.reshape(-1)
    n = flat.shape[0]

    # Pad only the lane remainder (rarely triggers); rows are handled by
    # letting Pallas clip the final partial block.
    lane_pad = (-n) % _LANES
    if lane_pad:
        flat = jnp.pad(flat, (0, lane_pad))

    x2 = flat.reshape(-1, _LANES)  # (rows, 128), lane-dense
    rows = x2.shape[0]

    if rows <= block_rows:
        br = rows              # full extent along rows -> always a legal block
    else:
        br = block_rows        # multiple of 8; last block clipped by Pallas
    grid = (pl.cdiv(rows, br),)

    # Precompute 0.5 * alpha on the host for the tanh formulation.
    half_alpha = (0.5 * jnp.asarray(alpha, dtype=jnp.float32)).reshape(1)

    out2 = pl.pallas_call(
        _ada_sigmoid_kernel,
        out_shape=jax.ShapeDtypeStruct(x2.shape, orig_dtype),
        grid_spec=pltpu.PrefetchScalarGridSpec(
            num_scalar_prefetch=1,                       # 0.5*alpha -> SMEM
            grid=grid,
            in_specs=[
                pl.BlockSpec((br, _LANES), lambda i, ha_ref: (i, 0)),
            ],
            out_specs=pl.BlockSpec((br, _LANES), lambda i, ha_ref: (i, 0)),
        ),
        compiler_params=pltpu.CompilerParams(
            dimension_semantics=("parallel",),
        ),
    )(half_alpha, x2)

    out = out2.reshape(-1)
    if lane_pad:
        out = out[:n]
    return out.reshape(orig_shape)


if __name__ == "__main__":
    # Deterministic parameter init (matches nn.Parameter(torch.tensor(1.0)))
    alpha = 1.0

    key = jax.random.PRNGKey(0)
    x = jax.random.normal(key, (2, 4, 16, 16), dtype=jnp.float32)  # NCHW

    y = ada_sigmoid(x, alpha)
    y = jax.block_until_ready(y)

    # Reference check in plain JAX (exp form, f32).
    y_ref = 1.0 / (1.0 + jnp.exp(-jnp.float32(alpha) * x))
    assert y.shape == x.shape and y.dtype == x.dtype
    # tanh-based sigmoid differs from the exp form by a few ULPs -> 1e-5 tol.
    assert jnp.allclose(y, y_ref, atol=1e-5, rtol=1e-5)

    print("KERNEL_OK")
</pallas_src>

<mosaic_0001>
module attributes {stable_mosaic.version = 11 : i64} {
  func.func @_ada_sigmoid_kernel(%arg0: i32, %arg1: memref<1xf32, #tpu.memory_space<smem>>, %arg2: memref<16x128xf32, #tpu.memory_space<vmem>>, %arg3: memref<16x128xf32, #tpu.memory_space<vmem>>) attributes {dimension_semantics = [#tpu.dimension_semantics<parallel>], iteration_bounds = array<i64: 1>, scalar_prefetch = 1 : i64, scratch_operands = 0 : i64, tpu.core_type = #tpu.core_type<tc>, window_params = [{transform_indices = @transform_0, window_bounds = array<i64: 16, 128>}, {transform_indices = @transform_1, window_bounds = array<i64: 16, 128>}]} {
    %c0 = arith.constant 0 : index
    %0 = memref.load %arg1[%c0] : memref<1xf32, #tpu.memory_space<smem>>
    %c0_0 = arith.constant 0 : index
    %c0_1 = arith.constant 0 : index
    %1 = vector.load %arg2[%c0_0, %c0_1] : memref<16x128xf32, #tpu.memory_space<vmem>>, vector<16x128xf32>
    %2 = vector.broadcast %0 : f32 to vector<16x128xf32>
    %3 = arith.mulf %2, %1 : vector<16x128xf32>
    %4 = math.tanh %3 : vector<16x128xf32>
    %cst = arith.constant 1.000000e+00 : f32
    %5 = vector.broadcast %cst : f32 to vector<16x128xf32>
    %6 = arith.addf %4, %5 : vector<16x128xf32>
    %cst_2 = arith.constant 5.000000e-01 : f32
    %7 = vector.broadcast %cst_2 : f32 to vector<16x128xf32>
    %8 = arith.mulf %7, %6 : vector<16x128xf32>
    %c0_3 = arith.constant 0 : index
    %c0_4 = arith.constant 0 : index
    %9 = vector.load %arg3[%c0_3, %c0_4] : memref<16x128xf32, #tpu.memory_space<vmem>>, vector<16x128xf32>
    tpu.vector_store %arg3[%c0_3, %c0_4], %8 {strides = array<i32>} : memref<16x128xf32, #tpu.memory_space<vmem>>, vector<16x128xf32>,
    return
  }
  func.func @transform_0(%arg0: i32, %arg1: memref<1xf32, #tpu.memory_space<smem>>) -> (i32, i32) {
    %c0_i32 = arith.constant 0 : i32
    %c0_i32_0 = arith.constant 0 : i32
    return %arg0, %c0_i32 : i32, i32
  }
  func.func @transform_1(%arg0: i32, %arg1: memref<1xf32, #tpu.memory_space<smem>>) -> (i32, i32) {
    %c0_i32 = arith.constant 0 : i32
    %c0_i32_0 = arith.constant 0 : i32
    return %arg0, %c0_i32 : i32, i32
  }
}

</mosaic_0001>

<bundles_post_ra>
// kernel: tpu_custom_call.1
= control target key start
LH: loop header
LB: loop body
LE: loop exit
PB: predicated region body
PF: predicated region fallthrough
CT: control target
= control target key end

     0   :  { %8 = vsyncpa [#allocation5], 0  ;;  %s164_s0 = inlined_call_operand.<no memory space> [shape: f32[1], index: 0, kind: input, shape index: {}]   ;;  %s165_s1 = inlined_call_operand.hbm [shape: f32[16,128], index: 1, kind: input, shape index: {}]   ;;  %s166_s2 = inlined_call_operand.hbm [shape: f32[16,128], index: 2, kind: output, shape index: {}]  }
   0x1   :  { %9 = vsyncpa [#allocation6], 0  ;;  %s112_s9 = smov [#allocation4]   ;;  %s64_s13 = scalar_lea.hbm %s165_s1, 256 }
   0x2   :  { %s15_s10 = sshll.u32 %s112_s9, 4  ;;  %p65_p0 = scmp.ne.s32.totalorder %s165_s1, %s64_s13  ;;  %s16_s10 = int_to_ptr.vmem [resolvable:$true] %s15_s10 }
   0x3   :  { %p68_p1 = scmp.lt.u32.totalorder %s64_s13, %s165_s1 }
   0x5   :  { %p70_p2 = pnand %p68_p1, %p65_p0 }
   0x7   :  { %73 = shalt.err (!%p70_p2)
}
   0x8   :  { %s74_s18 = scalar_lea.vmem %s16_s10, 256  ;;  %p79_p4 = scmp.lt.s32.totalorder %s16_s10, %s16_s10 }
   0x9   :  { %p75_p3 = scmp.ne.s32.totalorder %s16_s10, %s74_s18  ;;  %p80_p5 = scmp.lt.s32.totalorder %s74_s18, %s74_s18 }
   0xb   :  { %p81_p6 = por %p80_p5, %p79_p4 }
   0xd   :  { %p82_p7 = pnand %p81_p6, %p75_p3 }
   0xf   :  { %85 = shalt.err (!%p82_p7)
}
  0x10   :  { %s113_s19 = smov 128   ;;  %s114_s20 = smov 8  }
  0x11   :  { %21 = dma.hbm_to_vmem [thread:$0]  %s165_s1, 256, %s16_s10, [#allocation5], %s113_s19, %s113_s19, %s114_s20  }
  0x12   :  { %108 = dma.done.wait [#allocation5], 256  }
  0x13   :  { %109 = vsyncadd [#allocation5], 4294967040  ;;  %v28_v0 = vstv %s164_s0  ;;  %v26_v1 = vld [vmem:[#allocation4] sm:$0xff]  ;;  %v27_v2 = vld [vmem:[#allocation4 + $0x8] sm:$0xff]  ;;  %s115_s25 = smov [#allocation7]  }
  0x14   :  { %v29_v3 = vmul.f32 %v28_v0, %v26_v1  ;;  %v30_v4 = vmul.f32 %v28_v0, %v27_v2  ;;  %s44_s26 = sshll.u32 %s115_s25, 4  ;;  %s45_s26 = int_to_ptr.vmem [resolvable:$true] %s44_s26 }
  0x15   :  { %s86_s1 = scalar_lea.vmem %s45_s26, 256  ;;  %p91_p9 = scmp.lt.s32.totalorder %s45_s26, %s45_s26 }
  0x16   :  { %60 = vtanh.f32 %v29_v3  ;;  %p87_p8 = scmp.ne.s32.totalorder %s45_s26, %s86_s1  ;;  %p92_p10 = scmp.lt.s32.totalorder %s86_s1, %s86_s1 }
  0x17   :  { %62 = vtanh.f32 %v30_v4 }
  0x18   :  { %p93_p11 = por %p92_p10, %p91_p9 }
  0x1a   :  { %p94_p12 = pnand %p93_p11, %p87_p8 }
  0x20   :  { %v61_v5 = vpop.eup %60 }
  0x21   :  { %v63_v6 = vpop.eup %62  ;;  %v33_v7 = vadd.f32 1.0, %v61_v5 }
  0x22   :  { %v34_v8 = vadd.f32 1.0, %v63_v6 }
  0x23   :  { %v35_v9 = vmul.f32 0.5, %v33_v7 }
  0x24   :  { %v36_v10 = vmul.f32 0.5, %v34_v8 }
  0x25   :  { %37 = vst [vmem:[#allocation7] sm:$0xff] %v35_v9 }
  0x26   :  { %38 = vst [vmem:[#allocation7 + $0x8] sm:$0xff] %v36_v10 }
  0x27   :  { %97 = shalt.err (!%p94_p12)
}
  0x28   :  { %s98_s28 = scalar_lea.hbm %s166_s2, 256 }
  0x29   :  { %p99_p13 = scmp.ne.s32.totalorder %s166_s2, %s98_s28  ;;  %p102_p0 = scmp.lt.u32.totalorder %s98_s28, %s166_s2 }
  0x2b   :  { %p104_p1 = pnand %p102_p0, %p99_p13 }
  0x2d   :  { %107 = shalt.err (!%p104_p1)
}
  0x2e   :  { %50 = dma.vmem_to_hbm [thread:$0]  %s45_s26, 256, %s166_s2, [#allocation6], %s113_s19, %s113_s19, %s114_s20  }
  0x2f   :  { %110 = dma.done.wait [#allocation6], 256  }
  0x30   :  { %111 = vsyncadd [#allocation6], 4294967040 }
  0x31   :  { %54 = vsyncpa [#allocation5], 1 }
  0x32   :  { %55 = vsyncpa [#allocation6], 1 }

</bundles_post_ra>
